<compile_context>
chip_gen: v7x
topology: tpu7x:2x2x1
jax: 0.10.0
libtpu: 0.0.40
codegen_flags: <defaults>
</compile_context>

<pallas_src>
import functools

import jax
import jax.numpy as jnp
from jax import lax
from jax.experimental import pallas as pl
from jax.experimental.pallas import tpu as pltpu


# --------------------------------------------------------------------------
# Tile / VMEM sizing helpers
# --------------------------------------------------------------------------
def _vmem_capacity_bytes():
    """Physical VMEM per TensorCore; conservative (v7x) fallback."""
    try:
        cap = getattr(pltpu.get_tpu_info(), "vmem_capacity_bytes", None)
        if cap:
            return int(cap)
    except Exception:
        pass
    return 64 * 2 ** 20


def _largest_divisor_tile(n, candidates):
    for t in candidates:
        if t <= n and n % t == 0:
            return t
    # Awkward n: one full-extent block.
    # TODO(synk): pad B to a multiple of 256 and mask padded rows/cols instead.
    return n


def _vmem_estimate_bytes(tm, tn, batch, dim, isize):
    gj = batch // tn
    a_bufs = 2 * tm * dim * isize          # double-buffered a row tile
    b_bufs = 2 * tn * dim * isize          # double-buffered b column tile
    row_vecs = 5 * tm * 128 * 4            # (tm,1) scratch x3 + row output x2 (lane-padded)
    col_vecs = 4 * gj * 8 * tn * 4         # (gj,1,tn) scratch x3 + resident col output
    tile_tmp = 4 * tm * tn * 4             # logits tile + exp temporaries headroom
    return a_bufs + b_bufs + row_vecs + col_vecs + tile_tmp


def _choose_tiles(batch, dim, isize):
    cap = _vmem_capacity_bytes()
    budget = int(0.4 * cap)
    # Column tile: MXU-native width (256 on v6e/v7x, fine on v5e).
    tn = _largest_divisor_tile(batch, (256, 128, 64, 32, 16, 8))
    # Row tile: as large as the VMEM budget allows -> fewer repeated b reads.
    tm = tn
    for cand in (2048, 1024, 512, 256, 128, 64, 32, 16, 8):
        if cand < tn or cand > batch or batch % cand != 0:
            continue
        if _vmem_estimate_bytes(cand, tn, batch, dim, isize) <= budget:
            tm = cand
            break
    est = _vmem_estimate_bytes(tm, tn, batch, dim, isize)
    vmem_limit = int(min(max(2 * est, 32 * 2 ** 20), int(0.9 * cap)))
    return tm, tn, vmem_limit


# --------------------------------------------------------------------------
# Pass 1 (mem-bound, run once per input): row-normalize and fold `scale`
# (= 1/T for f1, 1.0 for f2) so the CE kernel only does plain dot products.
# --------------------------------------------------------------------------
def _normalize_kernel(x_ref, o_ref, *, scale):
    x = x_ref[...].astype(jnp.float32)
    # TODO(synk): PyTorch CosineSimilarity clamps the *product* ||x||*||y|| at
    # 1e-8; this per-side clamp (||x|| >= 1e-8) only differs for ~zero rows.
    inv = lax.rsqrt(jnp.maximum(jnp.sum(x * x, axis=-1, keepdims=True), 1e-16))
    o_ref[...] = (x * (inv * scale)).astype(o_ref.dtype)


def _normalize(x, scale):
    b, d = x.shape
    tb = _largest_divisor_tile(b, (1024, 512, 256, 128, 64, 32, 16, 8))
    return pl.pallas_call(
        functools.partial(_normalize_kernel, scale=float(scale)),
        out_shape=jax.ShapeDtypeStruct((b, d), x.dtype),
        grid_spec=pltpu.PrefetchScalarGridSpec(
            num_scalar_prefetch=0,
            grid=(b // tb,),
            in_specs=[pl.BlockSpec((tb, d), lambda r: (r, 0))],
            out_specs=pl.BlockSpec((tb, d), lambda r: (r, 0)),
        ),
        compiler_params=pltpu.CompilerParams(
            dimension_semantics=("parallel",)),
    )(x)


# --------------------------------------------------------------------------
# Pass 2: fused row/column cross-entropy terms over sim = an @ bn.T.
#   row_out[g]  = logsumexp_j sim[g, j] - sim[g, g]
#   col_out[g]  = logsumexp_i sim[i, g] - sim[g, g]
# --------------------------------------------------------------------------
def _simclr_ce_kernel(a_ref, b_ref, row_out_ref, col_out_ref,
                      m_row, l_row, d_row, m_col, l_col, d_col):
    i = pl.program_id(0)          # row-block index    (outer, 'arbitrary')
    j = pl.program_id(1)          # column-block index (inner, 'arbitrary')
    tm = a_ref.shape[0]
    tn = b_ref.shape[0]

    # Reset row accumulators at the start of each column sweep.
    @pl.when(j == 0)
    def _():
        m_row[...] = jnp.full(m_row.shape, -jnp.inf, dtype=jnp.float32)
        l_row[...] = jnp.zeros(l_row.shape, dtype=jnp.float32)
        d_row[...] = jnp.zeros(d_row.shape, dtype=jnp.float32)

    # Reset column accumulators the first time each column block is visited.
    @pl.when(i == 0)
    def _():
        m_col[j] = jnp.full((1, tn), -jnp.inf, dtype=jnp.float32)
        l_col[j] = jnp.zeros((1, tn), dtype=jnp.float32)
        d_col[j] = jnp.zeros((1, tn), dtype=jnp.float32)

    # Logits tile on the MXU in the input dtype, f32 accumulation, contracting
    # dim 1 of both operands (a @ b.T without materializing the transpose).
    s = lax.dot_general(a_ref[...], b_ref[...],
                        dimension_numbers=(((1,), (1,)), ((), ())),
                        preferred_element_type=jnp.float32)      # (tm, tn)

    # Diagonal logits sim[g, g]: only tiles intersecting the diagonal, using
    # the exact same MXU values that feed the logsumexp.
    row0 = i * tm
    col0 = j * tn

    @pl.when(jnp.logical_and(row0 < col0 + tn, col0 < row0 + tm))
    def _():
        r = lax.broadcasted_iota(jnp.int32, (tm, tn), 0) + row0
        c = lax.broadcasted_iota(jnp.int32, (tm, tn), 1) + col0
        sd = jnp.where(r == c, s, 0.0)
        d_row[...] = d_row[...] + jnp.sum(sd, axis=1, keepdims=True)
        d_col[j] = d_col[j] + jnp.sum(sd, axis=0, keepdims=True)

    # Online logsumexp, row direction (reduce over columns / lanes).
    m_prev = m_row[...]
    m_new = jnp.maximum(m_prev, jnp.max(s, axis=1, keepdims=True))
    l_row[...] = (jnp.exp(m_prev - m_new) * l_row[...]
                  + jnp.sum(jnp.exp(s - m_new), axis=1, keepdims=True))
    m_row[...] = m_new

    # Online logsumexp, column direction (reduce over rows / sublanes).
    cm_prev = m_col[j]
    cm_new = jnp.maximum(cm_prev, jnp.max(s, axis=0, keepdims=True))
    l_col[j] = (jnp.exp(cm_prev - cm_new) * l_col[j]
                + jnp.sum(jnp.exp(s - cm_new), axis=0, keepdims=True))
    m_col[j] = cm_new

    # Finalize per-row CE terms at the end of the column sweep.
    @pl.when(j == pl.num_programs(1) - 1)
    def _():
        row_out_ref[...] = m_row[...] + jnp.log(l_row[...]) - d_row[...]

    # Finalize per-column CE terms once the last row block has been folded in.
    @pl.when(i == pl.num_programs(0) - 1)
    def _():
        col_out_ref[j] = m_col[j] + jnp.log(l_col[j]) - d_col[j]


def _ce_terms(an, bn):
    batch, dim = an.shape
    isize = jnp.dtype(an.dtype).itemsize
    tm, tn, vmem_limit = _choose_tiles(batch, dim, isize)
    gi, gj = batch // tm, batch // tn

    row_terms, col_terms = pl.pallas_call(
        _simclr_ce_kernel,
        out_shape=(jax.ShapeDtypeStruct((batch, 1), jnp.float32),
                   jax.ShapeDtypeStruct((gj, 1, tn), jnp.float32)),
        grid_spec=pltpu.PrefetchScalarGridSpec(
            num_scalar_prefetch=0,
            grid=(gi, gj),
            in_specs=[
                pl.BlockSpec((tm, dim), lambda i, j: (i, 0)),   # a row tile
                pl.BlockSpec((tn, dim), lambda i, j: (j, 0)),   # b column tile
            ],
            out_specs=[
                # Row terms: standard per-row-block accumulator output.
                pl.BlockSpec((tm, 1), lambda i, j: (i, 0)),
                # Column terms: VMEM-resident full block, written at i == last
                # (avoids revisiting a tiled output block across the i axis).
                pl.BlockSpec((gj, 1, tn), lambda i, j: (0, 0, 0)),
            ],
            scratch_shapes=[
                pltpu.VMEM((tm, 1), jnp.float32),       # row running max
                pltpu.VMEM((tm, 1), jnp.float32),       # row running sum(exp)
                pltpu.VMEM((tm, 1), jnp.float32),       # row diagonal logits
                pltpu.VMEM((gj, 1, tn), jnp.float32),   # col running max
                pltpu.VMEM((gj, 1, tn), jnp.float32),   # col running sum(exp)
                pltpu.VMEM((gj, 1, tn), jnp.float32),   # col diagonal logits
            ],
        ),
        compiler_params=pltpu.CompilerParams(
            # Both row and column accumulators are carried across grid axes.
            dimension_semantics=("arbitrary", "arbitrary"),
            vmem_limit_bytes=vmem_limit,
        ),
        cost_estimate=pl.CostEstimate(
            flops=int(2 * batch * batch * dim),
            transcendentals=int(2 * batch * batch),
            bytes_accessed=int((gi + 1) * batch * dim * isize + 8 * batch),
        ),
    )(an, bn)
    return row_terms, col_terms


def simclr_loss(f1, f2, temperature):
    """Pallas implementation of SimCLRLoss.forward(f1, f2)."""
    batch, dim = f1.shape
    assert f2.shape == (batch, dim)
    an = _normalize(f1, 1.0 / float(temperature))   # 1/T folded into this side
    bn = _normalize(f2, 1.0)
    row_terms, col_terms = _ce_terms(an, bn)
    return 0.5 * (jnp.mean(row_terms) + jnp.mean(col_terms.reshape(batch)))


# --------------------------------------------------------------------------
# Pure-JAX reference mirroring the PyTorch module (for the self-check).
# --------------------------------------------------------------------------
def _reference(f1, f2, temperature):
    f1 = f1.astype(jnp.float32)
    f2 = f2.astype(jnp.float32)
    n1 = jnp.linalg.norm(f1, axis=-1, keepdims=True)
    n2 = jnp.linalg.norm(f2, axis=-1, keepdims=True)
    sim = (f1 @ f2.T) / jnp.maximum(n1 * n2.T, 1e-8) / temperature
    labels = jnp.arange(f1.shape[0])

    def ce(logits):
        lse = jax.nn.logsumexp(logits, axis=1)
        return jnp.mean(lse - logits[jnp.arange(logits.shape[0]), labels])

    return 0.5 * (ce(sim) + ce(sim.T))


if __name__ == "__main__":
    key = jax.random.PRNGKey(0)
    k1, k2 = jax.random.split(key)
    B, D = 8, 32            # small (batch, feature_dim) consistent with the module
    T = 0.5

    f1 = jax.random.normal(k1, (B, D), dtype=jnp.float32)
    f2 = jax.random.normal(k2, (B, D), dtype=jnp.float32)

    loss = jax.block_until_ready(simclr_loss(f1, f2, T))

    ref = _reference(f1, f2, T)
    assert jnp.allclose(loss, ref, atol=1e-4, rtol=1e-4), (loss, ref)

    print("KERNEL_OK")
</pallas_src>

<mosaic_0001>
module attributes {stable_mosaic.version = 11 : i64} {
  func.func @_normalize_kernel(%arg0: i32, %arg1: memref<8x32xf32, #tpu.memory_space<vmem>>, %arg2: memref<8x32xf32, #tpu.memory_space<vmem>>) attributes {dimension_semantics = [#tpu.dimension_semantics<parallel>], iteration_bounds = array<i64: 1>, scalar_prefetch = 0 : i64, scratch_operands = 0 : i64, tpu.core_type = #tpu.core_type<tc>, window_params = [{transform_indices = @transform_0, window_bounds = array<i64: 8, 32>}, {transform_indices = @transform_1, window_bounds = array<i64: 8, 32>}]} {
    %c0 = arith.constant 0 : index
    %c0_0 = arith.constant 0 : index
    %0 = vector.load %arg1[%c0, %c0_0] : memref<8x32xf32, #tpu.memory_space<vmem>>, vector<8x32xf32>
    %1 = arith.mulf %0, %0 : vector<8x32xf32>
    %cst = arith.constant dense<0.000000e+00> : vector<8xf32>
    %2 = vector.multi_reduction <add>, %1, %cst [1] : vector<8x32xf32> to vector<8xf32>
    %3 = vector.shape_cast %2 : vector<8xf32> to vector<8x1xf32>
    %cst_1 = arith.constant 1.000000e-16 : f32
    %4 = vector.broadcast %cst_1 : f32 to vector<8x1xf32>
    %5 = arith.maximumf %3, %4 : vector<8x1xf32>
    %6 = math.rsqrt %5 : vector<8x1xf32>
    %cst_2 = arith.constant 2.000000e+00 : f32
    %7 = vector.broadcast %cst_2 : f32 to vector<8x1xf32>
    %8 = arith.mulf %6, %7 : vector<8x1xf32>
    %9 = vector.broadcast %8 : vector<8x1xf32> to vector<8x32xf32>
    %10 = arith.mulf %0, %9 : vector<8x32xf32>
    %c0_3 = arith.constant 0 : index
    %c0_4 = arith.constant 0 : index
    %11 = vector.load %arg2[%c0_3, %c0_4] : memref<8x32xf32, #tpu.memory_space<vmem>>, vector<8x32xf32>
    tpu.vector_store %arg2[%c0_3, %c0_4], %10 {strides = array<i32>} : memref<8x32xf32, #tpu.memory_space<vmem>>, vector<8x32xf32>,
    return
  }
  func.func @transform_0(%arg0: i32) -> (i32, i32) {
    %c0_i32 = arith.constant 0 : i32
    %c0_i32_0 = arith.constant 0 : i32
    return %arg0, %c0_i32 : i32, i32
  }
  func.func @transform_1(%arg0: i32) -> (i32, i32) {
    %c0_i32 = arith.constant 0 : i32
    %c0_i32_0 = arith.constant 0 : i32
    return %arg0, %c0_i32 : i32, i32
  }
}

</mosaic_0001>

<bundles_post_ra>
// kernel: tpu_custom_call.1
= control target key start
LH: loop header
LB: loop body
LE: loop exit
PB: predicated region body
PF: predicated region fallthrough
CT: control target
= control target key end

     0   :  { %6 = vsyncpa [#allocation3], 0  ;;  %s135_s0 = inlined_call_operand.hbm [shape: f32[8,32], index: 0, kind: input, shape index: {}]   ;;  %s136_s1 = inlined_call_operand.hbm [shape: f32[8,32], index: 1, kind: output, shape index: {}]  }
   0x1   :  { %7 = vsyncpa [#allocation4], 0  ;;  %s99_s6 = smov [#allocation2]   ;;  %s51_s10 = scalar_lea.hbm %s135_s0, 128 }
   0x2   :  { %s14_s7 = sshll.u32 %s99_s6, 4  ;;  %p52_p0 = scmp.ne.s32.totalorder %s135_s0, %s51_s10  ;;  %s15_s7 = int_to_ptr.vmem [resolvable:$true] %s14_s7 }
   0x3   :  { %p55_p1 = scmp.lt.u32.totalorder %s51_s10, %s135_s0 }
   0x5   :  { %p57_p2 = pnand %p55_p1, %p52_p0 }
   0x7   :  { %60 = shalt.err (!%p57_p2)
}
   0x8   :  { %s61_s15 = scalar_lea.vmem %s15_s7, 128  ;;  %p66_p4 = scmp.lt.s32.totalorder %s15_s7, %s15_s7 }
   0x9   :  { %p62_p3 = scmp.ne.s32.totalorder %s15_s7, %s61_s15  ;;  %p67_p5 = scmp.lt.s32.totalorder %s61_s15, %s61_s15 }
   0xb   :  { %p68_p6 = por %p67_p5, %p66_p4 }
   0xd   :  { %p69_p7 = pnand %p68_p6, %p62_p3 }
   0xf   :  { %72 = shalt.err (!%p69_p7)
}
  0x10   :  { %17 = dma.hbm_to_vmem [thread:$0]  %s135_s0, 128, %s15_s7, [#allocation3]  }
  0x11   :  { %95 = dma.done.wait [#allocation3], 128  }
  0x12   :  { %96 = vsyncadd [#allocation3], 4294967168  ;;  %v21_v0 = vld [vmem:[#allocation2] sm:$0xff]  ;;  %vm23_vm0 = vcmask 261120   ;;  %s100_s18 = smov [#allocation5]  }
  0x13   :  { %v22_v1 = vmul.f32 %v21_v0, %v21_v0  ;;  %s38_s19 = sshll.u32 %s100_s18, 4  ;;  %s39_s19 = int_to_ptr.vmem [resolvable:$true] %s38_s19 }
  0x14   :  { %s73_s20 = scalar_lea.vmem %s39_s19, 128  ;;  %p78_p9 = scmp.lt.s32.totalorder %s39_s19, %s39_s19 }
  0x15   :  { %v24_v2 = vsel %vm23_vm0, %v22_v1, 0.0  ;;  %p74_p8 = scmp.ne.s32.totalorder %s39_s19, %s73_s20  ;;  %p79_p10 = scmp.lt.s32.totalorder %s73_s20, %s73_s20 }
  0x16   :  { %25 = vadd.xlane.f32.xlu0 %v24_v2 }
  0x17   :  { %p80_p11 = por %p79_p10, %p78_p9 }
  0x19   :  { %p81_p12 = pnand %p80_p11, %p74_p8 }
  0xa3   :  { %v26_v3 = vpop.xlane.xlu0 %25 }
  0xa4   :  { %v27_v4 = vmax.f32 %v26_v3, 1e-16 }
  0xa6   :  { %49 = vrsqrt.f32 %v27_v4 }
  0xb0   :  { %v50_v5 = vpop.eup %49 }
  0xb1   :  { %v29_v6 = vmul.f32 2.0, %v50_v5 }
  0xb3   :  { %v30_v7 = vmul.f32 %v29_v6, %v21_v0 }
  0xb5   :  { %31 = vst.msk [vmem:[#allocation5] sm:$0xff] %vm23_vm0, %v30_v7 }
  0xb6   :  { %84 = shalt.err (!%p81_p12)
}
  0xb7   :  { %s85_s22 = scalar_lea.hbm %s136_s1, 128 }
  0xb8   :  { %p86_p13 = scmp.ne.s32.totalorder %s136_s1, %s85_s22  ;;  %p89_p0 = scmp.lt.u32.totalorder %s85_s22, %s136_s1 }
  0xba   :  { %p91_p1 = pnand %p89_p0, %p86_p13 }
  0xbc   :  { %94 = shalt.err (!%p91_p1)
}
  0xbd   :  { %41 = dma.vmem_to_hbm [thread:$0]  %s39_s19, 128, %s136_s1, [#allocation4]  }
  0xbe   :  { %97 = dma.done.wait [#allocation4], 128  }
  0xbf   :  { %98 = vsyncadd [#allocation4], 4294967168 }
  0xc0   :  { %45 = vsyncpa [#allocation3], 1 }
  0xc1   :  { %46 = vsyncpa [#allocation4], 1 }

</bundles_post_ra>
